<compile_context>
chip_gen: v5e
topology: v5e:2x2
jax: 0.10.0
libtpu: 0.0.40
codegen_flags: <defaults>
</compile_context>

<pallas_src>
import jax
import jax.numpy as jnp
from jax.experimental import pallas as pl
from jax.experimental.pallas import tpu as pltpu

STATE_DIM = 17
ACTION_DIM = 3
HIDDEN_DIMS = [32, 64, 32]
LANE = 128       # lane-dense output width (actions live in lanes 0..ACTION_DIM-1)
TB_MAX = 1024    # max batch tile (multiple of 8); small enough for v7x VMEM budget


def _round_up(n, m):
    return ((n + m - 1) // m) * m


def _leaky_relu(x, negative_slope=0.01):
    # one vmul + one vmax (instead of cmp + select + mul); valid since slope < 1
    return jnp.maximum(x, negative_slope * x)


def actor_ddpg_kernel(
    x_ref,
    w1_ref, b1_ref,
    w2_ref, b2_ref,
    w3_ref, b3_ref,
    wa_ref, ba_ref,
    out_ref,
):
    # Layer 1: Linear(17 -> 32) + LeakyReLU
    x = x_ref[...].astype(jnp.bfloat16)
    h = jnp.dot(x, w1_ref[...], preferred_element_type=jnp.float32)
    h = _leaky_relu(h + b1_ref[...])

    # Layer 2: Linear(32 -> 64) + LeakyReLU
    h = jnp.dot(h.astype(jnp.bfloat16), w2_ref[...],
                preferred_element_type=jnp.float32)
    h = _leaky_relu(h + b2_ref[...])

    # Layer 3: Linear(64 -> 32) + LeakyReLU
    h = jnp.dot(h.astype(jnp.bfloat16), w3_ref[...],
                preferred_element_type=jnp.float32)
    h = _leaky_relu(h + b3_ref[...])

    # fc_action: Linear(32 -> 3, zero-padded to 128 lanes) + ReLU
    a = jnp.dot(h.astype(jnp.bfloat16), wa_ref[...],
                preferred_element_type=jnp.float32)
    out_ref[...] = jnp.maximum(a + ba_ref[...], 0.0).astype(out_ref.dtype)


def actor_ddpg_forward(x, packed, tb=TB_MAX):
    """x: [B, STATE_DIM] float32. packed: dict from pack_params()."""
    B = x.shape[0]
    TB = min(tb, _round_up(B, 8))          # batch tile, multiple of 8
    B_pad = _round_up(B, TB)
    if B_pad != B:
        x = jnp.pad(x, ((0, B_pad - B), (0, 0)))
    grid = (B_pad // TB,)

    w1, b1 = packed["w1"], packed["b1"]
    w2, b2 = packed["w2"], packed["b2"]
    w3, b3 = packed["w3"], packed["b3"]
    wa, ba = packed["wa"], packed["ba"]

    def tile_map(i):      # batch-tiled operands (x, out)
        return (i, 0)

    def const_map(i):     # VMEM-resident weights/biases (same block every step)
        return (0, 0)

    in_specs = [
        pl.BlockSpec((TB, STATE_DIM), tile_map),
        pl.BlockSpec(w1.shape, const_map), pl.BlockSpec(b1.shape, const_map),
        pl.BlockSpec(w2.shape, const_map), pl.BlockSpec(b2.shape, const_map),
        pl.BlockSpec(w3.shape, const_map), pl.BlockSpec(b3.shape, const_map),
        pl.BlockSpec(wa.shape, const_map), pl.BlockSpec(ba.shape, const_map),
    ]
    out_spec = pl.BlockSpec((TB, LANE), tile_map)

    flops = 2 * B_pad * (STATE_DIM * HIDDEN_DIMS[0]
                         + HIDDEN_DIMS[0] * HIDDEN_DIMS[1]
                         + HIDDEN_DIMS[1] * HIDDEN_DIMS[2]
                         + HIDDEN_DIMS[2] * LANE)
    weight_bytes = sum(int(a.size) * a.dtype.itemsize
                       for a in (w1, b1, w2, b2, w3, b3, wa, ba))
    bytes_accessed = B_pad * STATE_DIM * 4 + B_pad * LANE * 4 + weight_bytes

    out = pl.pallas_call(
        actor_ddpg_kernel,
        out_shape=jax.ShapeDtypeStruct((B_pad, LANE), jnp.float32),
        grid=grid,
        in_specs=in_specs,
        out_specs=out_spec,
        compiler_params=pltpu.CompilerParams(
            dimension_semantics=("parallel",)),
        cost_estimate=pl.CostEstimate(
            flops=flops, transcendentals=0, bytes_accessed=bytes_accessed),
    )(x, w1, b1, w2, b2, w3, b3, wa, ba)

    # Slice away batch padding and the 125 zero padding lanes.
    return out[:B, :ACTION_DIM]


def init_params(key):
    """PyTorch-Linear-style init: U(-1/sqrt(fan_in), +1/sqrt(fan_in)), f32,
    weights stored as [in, out] so the kernel computes x @ W + b."""
    dims = [STATE_DIM] + HIDDEN_DIMS + [ACTION_DIM]
    names = ["1", "2", "3", "a"]
    params = {}
    for name, d_in, d_out in zip(names, dims[:-1], dims[1:]):
        key, kw, kb = jax.random.split(key, 3)
        bound = float(1.0 / (d_in ** 0.5))
        params[f"w{name}"] = jax.random.uniform(
            kw, (d_in, d_out), jnp.float32, -bound, bound)
        params[f"b{name}"] = jax.random.uniform(
            kb, (1, d_out), jnp.float32, -bound, bound)
    return params


def pack_params(params):
    """Kernel layout: bf16 weights, f32 biases, final layer padded to 128 lanes."""
    packed = {}
    for name in ("1", "2", "3"):
        packed[f"w{name}"] = params[f"w{name}"].astype(jnp.bfloat16)
        packed[f"b{name}"] = params[f"b{name}"].astype(jnp.float32)
    wa = params["wa"].astype(jnp.bfloat16)
    ba = params["ba"].astype(jnp.float32)
    packed["wa"] = jnp.pad(wa, ((0, 0), (0, LANE - ACTION_DIM)))
    packed["ba"] = jnp.pad(ba, ((0, 0), (0, LANE - ACTION_DIM)))
    return packed


def reference_forward(x, packed):
    """Pure-JAX reference mirroring the kernel's numerics (bf16 matmul inputs,
    f32 accumulation/activations) and the PyTorch forward semantics."""
    h = x
    for name in ("1", "2", "3"):
        h = jnp.dot(h.astype(jnp.bfloat16), packed[f"w{name}"],
                    preferred_element_type=jnp.float32) + packed[f"b{name}"]
        h = jnp.maximum(h, 0.01 * h)
    a = jnp.dot(h.astype(jnp.bfloat16), packed["wa"],
                preferred_element_type=jnp.float32) + packed["ba"]
    return jnp.maximum(a, 0.0)[:, :ACTION_DIM]


if __name__ == "__main__":
    key = jax.random.PRNGKey(0)
    key, kx = jax.random.split(key)
    B = 8
    x = jax.random.normal(kx, (B, STATE_DIM), jnp.float32)

    params = init_params(key)
    packed = pack_params(params)

    out = actor_ddpg_forward(x, packed)
    out = jax.block_until_ready(out)

    ref = reference_forward(x, packed)
    assert out.shape == (B, ACTION_DIM), out.shape
    err = float(jnp.max(jnp.abs(out - ref)))
    assert err < 1e-3, f"max err {err}"

    print("KERNEL_OK")
</pallas_src>

<mosaic_0001>
module attributes {stable_mosaic.version = 11 : i64} {
  func.func @actor_ddpg_kernel(%arg0: i32, %arg1: memref<8x17xf32, #tpu.memory_space<vmem>>, %arg2: memref<17x32xbf16, #tpu.memory_space<vmem>>, %arg3: memref<1x32xf32, #tpu.memory_space<vmem>>, %arg4: memref<32x64xbf16, #tpu.memory_space<vmem>>, %arg5: memref<1x64xf32, #tpu.memory_space<vmem>>, %arg6: memref<64x32xbf16, #tpu.memory_space<vmem>>, %arg7: memref<1x32xf32, #tpu.memory_space<vmem>>, %arg8: memref<32x128xbf16, #tpu.memory_space<vmem>>, %arg9: memref<1x128xf32, #tpu.memory_space<vmem>>, %arg10: memref<8x128xf32, #tpu.memory_space<vmem>>) attributes {dimension_semantics = [#tpu.dimension_semantics<parallel>], iteration_bounds = array<i64: 1>, scalar_prefetch = 0 : i64, scratch_operands = 0 : i64, tpu.core_type = #tpu.core_type<tc>, window_params = [{transform_indices = @transform_0, window_bounds = array<i64: 8, 17>}, {pipeline_mode = #tpu.pipeline_mode<synchronous>, transform_indices = @transform_1, window_bounds = array<i64: 17, 32>}, {pipeline_mode = #tpu.pipeline_mode<synchronous>, transform_indices = @transform_2, window_bounds = array<i64: 1, 32>}, {pipeline_mode = #tpu.pipeline_mode<synchronous>, transform_indices = @transform_3, window_bounds = array<i64: 32, 64>}, {pipeline_mode = #tpu.pipeline_mode<synchronous>, transform_indices = @transform_4, window_bounds = array<i64: 1, 64>}, {pipeline_mode = #tpu.pipeline_mode<synchronous>, transform_indices = @transform_5, window_bounds = array<i64: 64, 32>}, {pipeline_mode = #tpu.pipeline_mode<synchronous>, transform_indices = @transform_6, window_bounds = array<i64: 1, 32>}, {pipeline_mode = #tpu.pipeline_mode<synchronous>, transform_indices = @transform_7, window_bounds = array<i64: 32, 128>}, {pipeline_mode = #tpu.pipeline_mode<synchronous>, transform_indices = @transform_8, window_bounds = array<i64: 1, 128>}, {transform_indices = @transform_9, window_bounds = array<i64: 8, 128>}]} {
    %c0 = arith.constant 0 : index
    %c0_0 = arith.constant 0 : index
    %0 = vector.load %arg1[%c0, %c0_0] : memref<8x17xf32, #tpu.memory_space<vmem>>, vector<8x17xf32>
    %1 = arith.truncf %0 : vector<8x17xf32> to vector<8x17xbf16>
    %c0_1 = arith.constant 0 : index
    %c0_2 = arith.constant 0 : index
    %2 = vector.load %arg2[%c0_1, %c0_2] : memref<17x32xbf16, #tpu.memory_space<vmem>>, vector<17x32xbf16>
    %cst = arith.constant dense<0.000000e+00> : vector<8x32xf32>
    %3 = tpu.matmul %1, %2, %cst {dimension_numbers = #tpu.dot_dimension_numbers<[1], [0], [0], [1], [0, 0, 1, 1], [], []>} : vector<8x17xbf16>, vector<17x32xbf16>, vector<8x32xf32> -> vector<8x32xf32>
    %c0_3 = arith.constant 0 : index
    %c0_4 = arith.constant 0 : index
    %4 = vector.load %arg3[%c0_3, %c0_4] : memref<1x32xf32, #tpu.memory_space<vmem>>, vector<1x32xf32>
    %5 = vector.broadcast %4 : vector<1x32xf32> to vector<8x32xf32>
    %6 = arith.addf %3, %5 : vector<8x32xf32>
    %cst_5 = arith.constant 0.00999999977 : f32
    %7 = vector.broadcast %cst_5 : f32 to vector<8x32xf32>
    %8 = arith.mulf %7, %6 : vector<8x32xf32>
    %9 = arith.maximumf %6, %8 : vector<8x32xf32>
    %10 = arith.truncf %9 : vector<8x32xf32> to vector<8x32xbf16>
    %c0_6 = arith.constant 0 : index
    %c0_7 = arith.constant 0 : index
    %11 = vector.load %arg4[%c0_6, %c0_7] : memref<32x64xbf16, #tpu.memory_space<vmem>>, vector<32x64xbf16>
    %cst_8 = arith.constant dense<0.000000e+00> : vector<8x64xf32>
    %12 = tpu.matmul %10, %11, %cst_8 {dimension_numbers = #tpu.dot_dimension_numbers<[1], [0], [0], [1], [0, 0, 1, 1], [], []>} : vector<8x32xbf16>, vector<32x64xbf16>, vector<8x64xf32> -> vector<8x64xf32>
    %c0_9 = arith.constant 0 : index
    %c0_10 = arith.constant 0 : index
    %13 = vector.load %arg5[%c0_9, %c0_10] : memref<1x64xf32, #tpu.memory_space<vmem>>, vector<1x64xf32>
    %14 = vector.broadcast %13 : vector<1x64xf32> to vector<8x64xf32>
    %15 = arith.addf %12, %14 : vector<8x64xf32>
    %cst_11 = arith.constant 0.00999999977 : f32
    %16 = vector.broadcast %cst_11 : f32 to vector<8x64xf32>
    %17 = arith.mulf %16, %15 : vector<8x64xf32>
    %18 = arith.maximumf %15, %17 : vector<8x64xf32>
    %19 = arith.truncf %18 : vector<8x64xf32> to vector<8x64xbf16>
    %c0_12 = arith.constant 0 : index
    %c0_13 = arith.constant 0 : index
    %20 = vector.load %arg6[%c0_12, %c0_13] : memref<64x32xbf16, #tpu.memory_space<vmem>>, vector<64x32xbf16>
    %cst_14 = arith.constant dense<0.000000e+00> : vector<8x32xf32>
    %21 = tpu.matmul %19, %20, %cst_14 {dimension_numbers = #tpu.dot_dimension_numbers<[1], [0], [0], [1], [0, 0, 1, 1], [], []>} : vector<8x64xbf16>, vector<64x32xbf16>, vector<8x32xf32> -> vector<8x32xf32>
    %c0_15 = arith.constant 0 : index
    %c0_16 = arith.constant 0 : index
    %22 = vector.load %arg7[%c0_15, %c0_16] : memref<1x32xf32, #tpu.memory_space<vmem>>, vector<1x32xf32>
    %23 = vector.broadcast %22 : vector<1x32xf32> to vector<8x32xf32>
    %24 = arith.addf %21, %23 : vector<8x32xf32>
    %cst_17 = arith.constant 0.00999999977 : f32
    %25 = vector.broadcast %cst_17 : f32 to vector<8x32xf32>
    %26 = arith.mulf %25, %24 : vector<8x32xf32>
    %27 = arith.maximumf %24, %26 : vector<8x32xf32>
    %28 = arith.truncf %27 : vector<8x32xf32> to vector<8x32xbf16>
    %c0_18 = arith.constant 0 : index
    %c0_19 = arith.constant 0 : index
    %29 = vector.load %arg8[%c0_18, %c0_19] : memref<32x128xbf16, #tpu.memory_space<vmem>>, vector<32x128xbf16>
    %cst_20 = arith.constant dense<0.000000e+00> : vector<8x128xf32>
    %30 = tpu.matmul %28, %29, %cst_20 {dimension_numbers = #tpu.dot_dimension_numbers<[1], [0], [0], [1], [0, 0, 1, 1], [], []>} : vector<8x32xbf16>, vector<32x128xbf16>, vector<8x128xf32> -> vector<8x128xf32>
    %c0_21 = arith.constant 0 : index
    %c0_22 = arith.constant 0 : index
    %31 = vector.load %arg9[%c0_21, %c0_22] : memref<1x128xf32, #tpu.memory_space<vmem>>, vector<1x128xf32>
    %32 = vector.broadcast %31 : vector<1x128xf32> to vector<8x128xf32>
    %33 = arith.addf %30, %32 : vector<8x128xf32>
    %cst_23 = arith.constant 0.000000e+00 : f32
    %34 = vector.broadcast %cst_23 : f32 to vector<8x128xf32>
    %35 = arith.maximumf %33, %34 : vector<8x128xf32>
    %c0_24 = arith.constant 0 : index
    %c0_25 = arith.constant 0 : index
    %36 = vector.load %arg10[%c0_24, %c0_25] : memref<8x128xf32, #tpu.memory_space<vmem>>, vector<8x128xf32>
    tpu.vector_store %arg10[%c0_24, %c0_25], %35 {strides = array<i32>} : memref<8x128xf32, #tpu.memory_space<vmem>>, vector<8x128xf32>,
    return
  }
  func.func @transform_0(%arg0: i32) -> (i32, i32) {
    %c0_i32 = arith.constant 0 : i32
    %c0_i32_0 = arith.constant 0 : i32
    return %arg0, %c0_i32 : i32, i32
  }
  func.func @transform_1(%arg0: i32) -> (i32, i32) {
    %c0_i32 = arith.constant 0 : i32
    %c0_i32_0 = arith.constant 0 : i32
    %c0_i32_1 = arith.constant 0 : i32
    return %c0_i32, %c0_i32_0 : i32, i32
  }
  func.func @transform_2(%arg0: i32) -> (i32, i32) {
    %c0_i32 = arith.constant 0 : i32
    %c0_i32_0 = arith.constant 0 : i32
    %c0_i32_1 = arith.constant 0 : i32
    return %c0_i32, %c0_i32_0 : i32, i32
  }
  func.func @transform_3(%arg0: i32) -> (i32, i32) {
    %c0_i32 = arith.constant 0 : i32
    %c0_i32_0 = arith.constant 0 : i32
    %c0_i32_1 = arith.constant 0 : i32
    return %c0_i32, %c0_i32_0 : i32, i32
  }
  func.func @transform_4(%arg0: i32) -> (i32, i32) {
    %c0_i32 = arith.constant 0 : i32
    %c0_i32_0 = arith.constant 0 : i32
    %c0_i32_1 = arith.constant 0 : i32
    return %c0_i32, %c0_i32_0 : i32, i32
  }
  func.func @transform_5(%arg0: i32) -> (i32, i32) {
    %c0_i32 = arith.constant 0 : i32
    %c0_i32_0 = arith.constant 0 : i32
    %c0_i32_1 = arith.constant 0 : i32
    return %c0_i32, %c0_i32_0 : i32, i32
  }
  func.func @transform_6(%arg0: i32) -> (i32, i32) {
    %c0_i32 = arith.constant 0 : i32
    %c0_i32_0 = arith.constant 0 : i32
    %c0_i32_1 = arith.constant 0 : i32
    return %c0_i32, %c0_i32_0 : i32, i32
  }
  func.func @transform_7(%arg0: i32) -> (i32, i32) {
    %c0_i32 = arith.constant 0 : i32
    %c0_i32_0 = arith.constant 0 : i32
    %c0_i32_1 = arith.constant 0 : i32
    return %c0_i32, %c0_i32_0 : i32, i32
  }
  func.func @transform_8(%arg0: i32) -> (i32, i32) {
    %c0_i32 = arith.constant 0 : i32
    %c0_i32_0 = arith.constant 0 : i32
    %c0_i32_1 = arith.constant 0 : i32
    return %c0_i32, %c0_i32_0 : i32, i32
  }
  func.func @transform_9(%arg0: i32) -> (i32, i32) {
    %c0_i32 = arith.constant 0 : i32
    %c0_i32_0 = arith.constant 0 : i32
    return %arg0, %c0_i32 : i32, i32
  }
}

</mosaic_0001>

<bundles_post_ra>
// kernel: tpu_custom_call.1
= control target key start
LH: loop header
LB: loop body
LE: loop exit
PB: predicated region body
PF: predicated region fallthrough
CT: control target
= control target key end

     0   :  { %14 = vsyncpa [#allocation3], 0  ;;  %s454_s0 = inlined_call_operand.hbm [shape: f32[8,17], index: 0, kind: input, shape index: {}]   ;;  %s455_s1 = inlined_call_operand.vmem [shape: bf16[17,32], index: 1, kind: input, shape index: {}]   ;;  %s456_s2 = inlined_call_operand.vmem [shape: f32[1,32], index: 2, kind: input, shape index: {}]   ;;  %s457_s3 = inlined_call_operand.vmem [shape: bf16[32,64], index: 3, kind: input, shape index: {}]   ;;  %s458_s4 = inlined_call_operand.vmem [shape: f32[1,64], index: 4, kind: input, shape index: {}]   ;;  %s459_s5 = inlined_call_operand.vmem [shape: bf16[64,32], index: 5, kind: input, shape index: {}]   ;;  %s460_s6 = inlined_call_operand.vmem [shape: f32[1,32], index: 6, kind: input, shape index: {}]   ;;  %s461_s7 = inlined_call_operand.vmem [shape: bf16[32,128], index: 7, kind: input, shape index: {}]   ;;  %s462_s8 = inlined_call_operand.vmem [shape: f32[1,128], index: 8, kind: input, shape index: {}]   ;;  %s463_s9 = inlined_call_operand.hbm [shape: f32[8,128], index: 9, kind: output, shape index: {}]  }
   0x1   :  { %15 = vsyncpa [#allocation4], 0  ;;  %s21_s11 = sshll.u32 %s454_s0, 4  ;;  %s351_s12 = smov [#allocation2]   ;;  %s22_s11 = int_to_ptr.hbm [resolvable:$true] %s21_s11 }
   0x2   :  { %s23_s13 = sshll.u32 %s351_s12, 4  ;;  %s24_s13 = int_to_ptr.vmem [resolvable:$true] %s23_s13 }
   0x3   :  { %26 = dma.hbm_to_vmem [thread:$0]  %s22_s11, 128, %s24_s13, [#allocation3]  }
   0x4   :  { %347 = dma.done.wait [#allocation3], 128  }
   0x5   :  { %348 = vsyncadd [#allocation3], 4294967168  ;;  %vm70_vm0 = vcmask 1040384   ;;  %v52_v0 = vld [vmem:[%s455_s1 + $0x8] sm:$0x1]  ;;  %v352_v2 = vmov 0  }
   0x6   :  { %v62_v1 = vunpack.c.l.b16 %v52_v0  ;;  %v72_v3 = vsel %vm70_vm0, 65535, %v352_v2  ;;  %v283_v6 = vld [vmem:[%s455_s1] sm:$0xff]  ;;  %vm66_vm1 = vcmask 138240   ;;  %v285_v9 = vld [vmem:[%s457_s3 + $0x8] sm:$0xff]  ;;  %v289_v11 = vld [vmem:[%s459_s5 + $0x18] sm:$0xff]  ;;  %vm112_vm2 = vcmask 261120  }
   0x7   :  { %v48_v7 = vld [vmem:[#allocation2] sm:$0xff]  ;;  %122 = vmatpush.bf16.msra.mxu1 %v285_v9  ;;  %176 = vmatpush.bf16.msra.mxu2 %v289_v11  ;;  %v288_v12 = vld [vmem:[%s459_s5 + $0x10] sm:$0xff]  ;;  %v287_v20 = vld [vmem:[%s459_s5 + $0x8] sm:$0xff]  ;;  %vm168_vm3 = vcmask 523264   ;;  %s353_s15 = smov [#allocation5]   ;;  %s233_s17 = sshll.u32 %s463_s9, 4  ;;  %s234_s17 = int_to_ptr.hbm [resolvable:$true] %s233_s17 }
   0x8   :  { %v64_v4 = vpack.c.b16 %v62_v1, %v62_v1  ;;  %v49_v8 = vpack.c.bf16 %v48_v7, %v48_v7  ;;  %v284_v10 = vld [vmem:[%s457_s3] sm:$0xff]  ;;  %v291_v29 = vld [vmem:[%s461_s7 + $0x8] sm:$0xff] }
   0x9   :  { %v295_v13 = vld [vmem:[%s456_s2] ss:$0 sm:$0xff]  ;;  %217 = vmatpush.bf16.msra.mxu3 %v291_v29 }
   0xa   :  { %v74_v5 = vand.u32 %v72_v3, %v64_v4  ;;  %v286_v21 = vld [vmem:[%s459_s5] sm:$0xff] }
   0xb   :  { %123 = vmatpush.bf16.msra.mxu1 %v284_v10  ;;  %177 = vmatpush.bf16.msra.mxu2 %v288_v12  ;;  %v296_v22 = vld [vmem:[%s458_s4] ss:$0 sm:$0xff] }
   0xc   :  { %82 = vmatpush.bf16.msra.mxu0 %v74_v5  ;;  %v290_v30 = vld [vmem:[%s461_s7] sm:$0xff]  ;;  %s231_s7 = sshll.u32 %s353_s15, 4  ;;  %s232_s7 = int_to_ptr.vmem [resolvable:$true] %s231_s7 }
   0xd   :  { %218 = vmatpush.bf16.msra.mxu3 %v290_v30  ;;  %v297_v31 = vld [vmem:[%s460_s6] ss:$0 sm:$0xff] }
   0xe   :  { %v298_v38 = vld [vmem:[%s462_s8] ss:$0 sm:$0xff] }
   0xf   :  { %178 = vmatpush.bf16.msra.mxu2 %v287_v20 }
  0x10   :  { %83 = vmatpush.bf16.msra.mxu0 %v283_v6 }
  0x13   :  { %247 = vmatmul.msk.bf16.vlgmr.msra.gmra.mxu0 %vm66_vm1, %v49_v8  ;;  %179 = vmatpush.bf16.msra.mxu2 %v286_v21 }
  0x90   :  { %v85_v14 = vpop.f32.mrf.mxu0 }
  0x91   :  { %v86_v15 = vadd.f32 %v295_v13, %v85_v14 }
  0x93   :  { %v89_v16 = vmul.f32 0.01, %v86_v15 }
  0x95   :  { %v90_v17 = vmax.f32 %v86_v15, %v89_v16 }
  0x97   :  { %v91_v18 = vpack.c.bf16 %v90_v17, %v90_v17 }
  0x98   :  { %v87_v19 = vpop.f32.mrf.mxu0 }
  0x99   :  { %256 = vmatmul.msk.bf16.vlgmr.msra.gmra.mxu1 %vm112_vm2, %v91_v18 }
 0x116   :  { %v125_v23 = vpop.f32.mrf.mxu1 }
 0x117   :  { %v126_v24 = vadd.f32 %v296_v22, %v125_v23 }
 0x119   :  { %v129_v25 = vmul.f32 0.01, %v126_v24 }
 0x11b   :  { %v130_v26 = vmax.f32 %v126_v24, %v129_v25 }
 0x11d   :  { %v131_v27 = vpack.c.bf16 %v130_v26, %v130_v26 }
 0x11e   :  { %v127_v28 = vpop.f32.mrf.mxu1 }
 0x11f   :  { %273 = vmatmul.msk.bf16.vlgmr.msra.gmra.mxu2 %vm168_vm3, %v131_v27 }
 0x1a2   :  { %v181_v32 = vpop.f32.mrf.mxu2 }
 0x1a3   :  { %v182_v33 = vadd.f32 %v297_v31, %v181_v32 }
 0x1a5   :  { %v185_v34 = vmul.f32 0.01, %v182_v33 }
 0x1a7   :  { %v186_v35 = vmax.f32 %v182_v33, %v185_v34 }
 0x1a9   :  { %v187_v36 = vpack.c.bf16 %v186_v35, %v186_v35 }
 0x1aa   :  { %v183_v37 = vpop.f32.mrf.mxu2 }
 0x1ab   :  { %282 = vmatmul.msk.bf16.vlgmr.msra.gmra.mxu3 %vm112_vm2, %v187_v36 }
 0x22e   :  { %v220_v39 = vpop.f32.mrf.mxu3 }
 0x22f   :  { %v221_v40 = vadd.f32 %v298_v38, %v220_v39 }
 0x231   :  { %v224_v41 = vmax.f32 %v221_v40, 0.0 }
 0x233   :  { %225 = vst [vmem:[#allocation5] sm:$0xff] %v224_v41 }
 0x234   :  { %236 = dma.vmem_to_hbm [thread:$0]  %s232_s7, 128, %s234_s17, [#allocation4]  }
 0x236   :  { %v222_v42 = vpop.f32.mrf.mxu3 }
 0x237   :  { %349 = dma.done.wait [#allocation4], 128  }
 0x238   :  { %350 = vsyncadd [#allocation4], 4294967168 }
 0x239   :  { %241 = vsyncpa [#allocation3], 1 }
 0x23a   :  { %242 = vsyncpa [#allocation4], 1 }

</bundles_post_ra>
